<compile_context>
chip_gen: v7x
topology: tpu7x:2x2x1
jax: 0.10.0
libtpu: 0.0.40
codegen_flags: <defaults>
</compile_context>

<pallas_src>
import functools

import jax
import jax.numpy as jnp
from jax import lax
from jax.experimental import pallas as pl
from jax.experimental.pallas import tpu as pltpu

ENTROPY_WEIGHT = 2.0

# VMEM budget for the 4 pipeline buffers (2 inputs x double-buffered), counted
# against the lane-padded footprint of an (rows, n) f32 block.
_PIPELINE_VMEM_BUDGET = 12 * 1024 * 1024
_VMEM_LIMIT_BYTES = 32 * 1024 * 1024   # safe on v5e/v6e (128 MiB) and v7x (64 MiB)


def _scan_loss_kernel(a_ref, nb_ref, cons_ref, prob_ref, *, batch):
    """One batch tile.

    a_ref / nb_ref: (block_rows, n) row-major logits (contiguous HBM reads).
    cons_ref:       (1, 8, 128) per-tile sum_i clamp(log sim_i, -100), broadcast.
    prob_ref:       (1, n, 128) per-tile sum_i softmax(anchor_i), lane-broadcast.
    """
    pid = pl.program_id(0)
    rows, n = a_ref.shape

    # Transpose each (rows, n) tile to the lane-dense (n, rows) layout via an
    # identity matmul on the MXU (idle otherwise).  For a clustering head
    # (small n) this is n*n*rows MACs per tile, i.e. ~free, and keeps every
    # exp/log on fully dense 128-lane vregs.
    # TODO(synk): for num_classes >= 128 an upstream [n, b] layout (or a direct
    # in-kernel vector transpose) would be preferable to the identity matmul.
    r_idx = lax.broadcasted_iota(jnp.int32, (n, n), 0)
    c_idx = lax.broadcasted_iota(jnp.int32, (n, n), 1)
    eye = (r_idx == c_idx).astype(jnp.float32)
    dn = (((1,), (1,)), ((), ()))
    at = lax.dot_general(eye, a_ref[...].astype(jnp.float32), dn,
                         preferred_element_type=jnp.float32)            # (n, rows)
    nt = lax.dot_general(eye, nb_ref[...].astype(jnp.float32), dn,
                         preferred_element_type=jnp.float32)            # (n, rows)

    # Rows of the (overhanging) last tile beyond the true batch are garbage;
    # mask them out of both reductions.  The mask is applied to the final
    # per-column quantities, so NaN/Inf garbage cannot leak (select does not
    # propagate the unselected branch).
    col = pid * rows + lax.broadcasted_iota(jnp.int32, (1, rows), 1)
    valid = col < batch                                                  # (1, rows)

    # Softmax statistics over the class (sublane) axis.
    a_max = jnp.max(at, axis=0, keepdims=True)                           # (1, rows)
    ea = jnp.exp(at - a_max)                                             # (n, rows)
    sa = jnp.sum(ea, axis=0, keepdims=True)                              # (1, rows)

    n_max = jnp.max(nt, axis=0, keepdims=True)
    en = jnp.exp(nt - n_max)
    sn = jnp.sum(en, axis=0, keepdims=True)

    s = jnp.sum(ea * en, axis=0, keepdims=True)                          # (1, rows)

    # BCE(sim, 1) contribution: -log(sim), in divide-free log form.  PyTorch's
    # BCELoss clamps the log at -100 (this also neutralizes log(0) = -inf).
    log_sim = jnp.log(s) - jnp.log(sa) - jnp.log(sn)
    log_sim = jnp.maximum(log_sim, -100.0)
    log_sim = jnp.where(valid, log_sim, 0.0)
    cons_tile = jnp.sum(log_sim, axis=1, keepdims=True)                  # (1, 1)

    # Per-class anchor probability mass (entropy term): one exact reciprocal
    # per batch row, reused across all n classes.
    inv_a = 1.0 / sa                                                     # (1, rows)
    a_prob = jnp.where(valid, ea * inv_a, 0.0)                           # (n, rows)
    prob_tile = jnp.sum(a_prob, axis=1, keepdims=True)                   # (n, 1)

    cons_ref[...] = jnp.broadcast_to(cons_tile.reshape(1, 1, 1), cons_ref.shape)
    prob_ref[...] = jnp.broadcast_to(prob_tile.reshape(1, n, 1), prob_ref.shape)


def scan_loss(anchors, neighbors, entropy_weight=ENTROPY_WEIGHT, block_rows=None):
    """anchors, neighbors: [b, num_classes] logits -> (total, consistency, entropy)."""
    assert anchors.shape == neighbors.shape and anchors.ndim == 2
    b, n = anchors.shape
    itemsize = jnp.dtype(anchors.dtype).itemsize

    if block_rows is None:
        # An (rows, n) block is stored lane-padded (last dim padded to 128) in
        # VMEM, so budget the 4 pipeline buffers against the padded footprint.
        padded_row_bytes = (pl.cdiv(n, 128) * 128) * itemsize
        block_rows = _PIPELINE_VMEM_BUDGET // (4 * padded_row_bytes)
    if block_rows >= b:
        block_rows = b                                    # single full block
    else:
        block_rows = max(8, (block_rows // 8) * 8)        # sublane-aligned tile
    grid_n = pl.cdiv(b, block_rows)

    cost = pl.CostEstimate(
        flops=4 * n * n * block_rows * grid_n + 12 * b * n,
        transcendentals=2 * b * n + 3 * b,
        bytes_accessed=2 * b * n * itemsize + grid_n * (8 + n) * 128 * 4,
    )

    kernel = functools.partial(_scan_loss_kernel, batch=b)
    cons_part, prob_part = pl.pallas_call(
        kernel,
        out_shape=(jax.ShapeDtypeStruct((grid_n, 8, 128), jnp.float32),
                   jax.ShapeDtypeStruct((grid_n, n, 128), jnp.float32)),
        grid_spec=pltpu.PrefetchScalarGridSpec(
            num_scalar_prefetch=0,
            grid=(grid_n,),
            in_specs=[pl.BlockSpec((block_rows, n), lambda i: (i, 0)),
                      pl.BlockSpec((block_rows, n), lambda i: (i, 0))],
            out_specs=(pl.BlockSpec((1, 8, 128), lambda i: (i, 0, 0)),
                       pl.BlockSpec((1, n, 128), lambda i: (i, 0, 0))),
        ),
        compiler_params=pltpu.CompilerParams(
            dimension_semantics=("parallel",),
            vmem_limit_bytes=_VMEM_LIMIT_BYTES),
        cost_estimate=cost,
    )(anchors, neighbors)

    # Tiny final reduction + entropy in plain JAX.  Per-tile partials are
    # broadcast across their block, so take element/lane 0 of each block.
    consistency = -jnp.sum(cons_part[:, 0, 0]) / b
    mean_prob = jnp.sum(prob_part[:, :, 0], axis=0) / b                  # (n,)
    x_ = jnp.maximum(mean_prob, 1e-8)
    entropy_loss = -jnp.sum(x_ * jnp.log(x_))
    total = consistency - entropy_weight * entropy_loss
    return total, consistency, entropy_loss


def _reference(anchors, neighbors, entropy_weight=ENTROPY_WEIGHT):
    a_prob = jax.nn.softmax(anchors, axis=1)
    n_prob = jax.nn.softmax(neighbors, axis=1)
    sim = jnp.sum(a_prob * n_prob, axis=1)
    cons = -jnp.mean(jnp.maximum(jnp.log(sim), -100.0))
    mp = jnp.maximum(jnp.mean(a_prob, axis=0), 1e-8)
    ent = -jnp.sum(mp * jnp.log(mp))
    return cons - entropy_weight * ent, cons, ent


if __name__ == "__main__":
    key = jax.random.PRNGKey(0)
    k1, k2, k3, k4 = jax.random.split(key, 4)

    # Test 1: small shape typical of a SCAN clustering head.
    b, num_classes = 8, 16
    anchors = jax.random.normal(k1, (b, num_classes), dtype=jnp.float32)
    neighbors = jax.random.normal(k2, (b, num_classes), dtype=jnp.float32)
    out = scan_loss(anchors, neighbors)
    jax.block_until_ready(out)
    ref = _reference(anchors, neighbors)
    for got, want in zip(out, ref):
        assert jnp.allclose(got, want, atol=1e-5, rtol=1e-5), (got, want)

    # Test 2: batch not a multiple of the tile — multi-step grid with an
    # overhanging (masked) last block and cross-tile partial reduction.
    b2, n2 = 700, 10
    anchors2 = jax.random.normal(k3, (b2, n2), dtype=jnp.float32)
    neighbors2 = jax.random.normal(k4, (b2, n2), dtype=jnp.float32)
    out2 = scan_loss(anchors2, neighbors2, block_rows=256)
    jax.block_until_ready(out2)
    ref2 = _reference(anchors2, neighbors2)
    for got, want in zip(out2, ref2):
        assert jnp.allclose(got, want, atol=1e-5, rtol=1e-5), (got, want)

    print("KERNEL_OK")
</pallas_src>

<mosaic_0001>
module attributes {stable_mosaic.version = 11 : i64} {
  func.func @_scan_loss_kernel(%arg0: i32, %arg1: memref<8x16xf32, #tpu.memory_space<vmem>>, %arg2: memref<8x16xf32, #tpu.memory_space<vmem>>, %arg3: memref<1x8x128xf32, #tpu.memory_space<vmem>>, %arg4: memref<1x16x128xf32, #tpu.memory_space<vmem>>) attributes {dimension_semantics = [#tpu.dimension_semantics<parallel>], iteration_bounds = array<i64: 1>, scalar_prefetch = 0 : i64, scratch_operands = 0 : i64, tpu.core_type = #tpu.core_type<tc>, window_params = [{transform_indices = @transform_0, window_bounds = array<i64: 8, 16>}, {transform_indices = @transform_1, window_bounds = array<i64: 8, 16>}, {transform_indices = @transform_2, window_bounds = array<i64: 1, 8, 128>}, {transform_indices = @transform_3, window_bounds = array<i64: 1, 16, 128>}]} {
    %0 = tpu.iota {dimensions = array<i32: 0>} : vector<16x16xi32>
    %1 = tpu.iota {dimensions = array<i32: 1>} : vector<16x16xi32>
    %2 = arith.cmpi eq, %0, %1 : vector<16x16xi32>
    %3 = arith.extui %2 : vector<16x16xi1> to vector<16x16xi32>
    %4 = arith.sitofp %3 : vector<16x16xi32> to vector<16x16xf32>
    %c0 = arith.constant 0 : index
    %c0_0 = arith.constant 0 : index
    %5 = vector.load %arg1[%c0, %c0_0] : memref<8x16xf32, #tpu.memory_space<vmem>>, vector<8x16xf32>
    %cst = arith.constant dense<0.000000e+00> : vector<16x8xf32>
    %6 = tpu.matmul %4, %5, %cst {dimension_numbers = #tpu.dot_dimension_numbers<[1], [1], [0], [0], [0, 0, 1, 0], [], []>} : vector<16x16xf32>, vector<8x16xf32>, vector<16x8xf32> -> vector<16x8xf32>
    %c0_1 = arith.constant 0 : index
    %c0_2 = arith.constant 0 : index
    %7 = vector.load %arg2[%c0_1, %c0_2] : memref<8x16xf32, #tpu.memory_space<vmem>>, vector<8x16xf32>
    %cst_3 = arith.constant dense<0.000000e+00> : vector<16x8xf32>
    %8 = tpu.matmul %4, %7, %cst_3 {dimension_numbers = #tpu.dot_dimension_numbers<[1], [1], [0], [0], [0, 0, 1, 0], [], []>} : vector<16x16xf32>, vector<8x16xf32>, vector<16x8xf32> -> vector<16x8xf32>
    %c8_i32 = arith.constant 8 : i32
    %9 = arith.muli %arg0, %c8_i32 : i32
    %10 = tpu.iota {dimensions = array<i32: 1>} : vector<1x8xi32>
    %11 = vector.broadcast %9 : i32 to vector<1x8xi32>
    %12 = arith.addi %11, %10 : vector<1x8xi32>
    %c8_i32_4 = arith.constant 8 : i32
    %13 = vector.broadcast %c8_i32_4 : i32 to vector<1x8xi32>
    %14 = arith.cmpi slt, %12, %13 : vector<1x8xi32>
    %cst_5 = arith.constant dense<0xFF800000> : vector<8xf32>
    %15 = vector.multi_reduction <maximumf>, %6, %cst_5 [0] : vector<16x8xf32> to vector<8xf32>
    %16 = vector.shape_cast %15 : vector<8xf32> to vector<1x8xf32>
    %17 = vector.broadcast %16 : vector<1x8xf32> to vector<16x8xf32>
    %18 = arith.subf %6, %17 : vector<16x8xf32>
    %19 = math.exp %18 : vector<16x8xf32>
    %cst_6 = arith.constant dense<0.000000e+00> : vector<8xf32>
    %20 = vector.multi_reduction <add>, %19, %cst_6 [0] : vector<16x8xf32> to vector<8xf32>
    %21 = vector.shape_cast %20 : vector<8xf32> to vector<1x8xf32>
    %cst_7 = arith.constant dense<0xFF800000> : vector<8xf32>
    %22 = vector.multi_reduction <maximumf>, %8, %cst_7 [0] : vector<16x8xf32> to vector<8xf32>
    %23 = vector.shape_cast %22 : vector<8xf32> to vector<1x8xf32>
    %24 = vector.broadcast %23 : vector<1x8xf32> to vector<16x8xf32>
    %25 = arith.subf %8, %24 : vector<16x8xf32>
    %26 = math.exp %25 : vector<16x8xf32>
    %cst_8 = arith.constant dense<0.000000e+00> : vector<8xf32>
    %27 = vector.multi_reduction <add>, %26, %cst_8 [0] : vector<16x8xf32> to vector<8xf32>
    %28 = vector.shape_cast %27 : vector<8xf32> to vector<1x8xf32>
    %29 = arith.mulf %19, %26 : vector<16x8xf32>
    %cst_9 = arith.constant dense<0.000000e+00> : vector<8xf32>
    %30 = vector.multi_reduction <add>, %29, %cst_9 [0] : vector<16x8xf32> to vector<8xf32>
    %31 = vector.shape_cast %30 : vector<8xf32> to vector<1x8xf32>
    %32 = math.log %31 : vector<1x8xf32>
    %33 = math.log %21 : vector<1x8xf32>
    %34 = arith.subf %32, %33 : vector<1x8xf32>
    %35 = math.log %28 : vector<1x8xf32>
    %36 = arith.subf %34, %35 : vector<1x8xf32>
    %cst_10 = arith.constant -1.000000e+02 : f32
    %37 = vector.broadcast %cst_10 : f32 to vector<1x8xf32>
    %38 = arith.maximumf %36, %37 : vector<1x8xf32>
    %cst_11 = arith.constant 0.000000e+00 : f32
    %39 = vector.broadcast %cst_11 : f32 to vector<1x8xf32>
    %40 = arith.select %14, %38, %39 : vector<1x8xi1>, vector<1x8xf32>
    %cst_12 = arith.constant dense<0.000000e+00> : vector<1xf32>
    %41 = vector.multi_reduction <add>, %40, %cst_12 [1] : vector<1x8xf32> to vector<1xf32>
    %42 = vector.shape_cast %41 : vector<1xf32> to vector<1x1xf32>
    %cst_13 = arith.constant 1.000000e+00 : f32
    %43 = vector.broadcast %cst_13 : f32 to vector<1x8xf32>
    %44 = arith.divf %43, %21 : vector<1x8xf32>
    %45 = vector.broadcast %44 : vector<1x8xf32> to vector<16x8xf32>
    %46 = arith.mulf %19, %45 : vector<16x8xf32>
    %cst_14 = arith.constant 0.000000e+00 : f32
    %47 = vector.shape_cast %14 : vector<1x8xi1> to vector<1x8xi1>
    %48 = vector.broadcast %47 : vector<1x8xi1> to vector<16x8xi1>
    %49 = vector.broadcast %cst_14 : f32 to vector<16x8xf32>
    %50 = arith.select %48, %46, %49 : vector<16x8xi1>, vector<16x8xf32>
    %cst_15 = arith.constant dense<0.000000e+00> : vector<16xf32>
    %51 = vector.multi_reduction <add>, %50, %cst_15 [1] : vector<16x8xf32> to vector<16xf32>
    %52 = vector.shape_cast %51 : vector<16xf32> to vector<16x1xf32>
    %53 = vector.shape_cast %42 : vector<1x1xf32> to vector<1x1x1xf32>
    %54 = vector.shape_cast %53 : vector<1x1x1xf32> to vector<1x1x1xf32>
    %55 = vector.broadcast %54 : vector<1x1x1xf32> to vector<1x8x128xf32>
    %c0_16 = arith.constant 0 : index
    %c0_17 = arith.constant 0 : index
    %c0_18 = arith.constant 0 : index
    %56 = vector.load %arg3[%c0_16, %c0_17, %c0_18] : memref<1x8x128xf32, #tpu.memory_space<vmem>>, vector<1x8x128xf32>
    tpu.vector_store %arg3[%c0_16, %c0_17, %c0_18], %55 {strides = array<i32>} : memref<1x8x128xf32, #tpu.memory_space<vmem>>, vector<1x8x128xf32>,
    %57 = vector.shape_cast %52 : vector<16x1xf32> to vector<1x16x1xf32>
    %58 = vector.shape_cast %57 : vector<1x16x1xf32> to vector<1x16x1xf32>
    %59 = vector.broadcast %58 : vector<1x16x1xf32> to vector<1x16x128xf32>
    %c0_19 = arith.constant 0 : index
    %c0_20 = arith.constant 0 : index
    %c0_21 = arith.constant 0 : index
    %60 = vector.load %arg4[%c0_19, %c0_20, %c0_21] : memref<1x16x128xf32, #tpu.memory_space<vmem>>, vector<1x16x128xf32>
    tpu.vector_store %arg4[%c0_19, %c0_20, %c0_21], %59 {strides = array<i32>} : memref<1x16x128xf32, #tpu.memory_space<vmem>>, vector<1x16x128xf32>,
    return
  }
  func.func @transform_0(%arg0: i32) -> (i32, i32) {
    %c0_i32 = arith.constant 0 : i32
    %c0_i32_0 = arith.constant 0 : i32
    return %arg0, %c0_i32 : i32, i32
  }
  func.func @transform_1(%arg0: i32) -> (i32, i32) {
    %c0_i32 = arith.constant 0 : i32
    %c0_i32_0 = arith.constant 0 : i32
    return %arg0, %c0_i32 : i32, i32
  }
  func.func @transform_2(%arg0: i32) -> (i32, i32, i32) {
    %c0_i32 = arith.constant 0 : i32
    %c0_i32_0 = arith.constant 0 : i32
    %c0_i32_1 = arith.constant 0 : i32
    return %arg0, %c0_i32, %c0_i32_0 : i32, i32, i32
  }
  func.func @transform_3(%arg0: i32) -> (i32, i32, i32) {
    %c0_i32 = arith.constant 0 : i32
    %c0_i32_0 = arith.constant 0 : i32
    %c0_i32_1 = arith.constant 0 : i32
    return %arg0, %c0_i32, %c0_i32_0 : i32, i32, i32
  }
}

</mosaic_0001>

<bundles_post_ra>
// kernel: tpu_custom_call.1
= control target key start
LH: loop header
LB: loop body
LE: loop exit
PB: predicated region body
PF: predicated region fallthrough
CT: control target
= control target key end

     0   :  { %9 = vsyncpa [#allocation3], 0  ;;  %s590_s0 = inlined_call_operand.hbm [shape: f32[8,16], index: 0, kind: input, shape index: {}]   ;;  %s591_s1 = inlined_call_operand.hbm [shape: f32[8,16], index: 1, kind: input, shape index: {}]   ;;  %s592_s2 = inlined_call_operand.hbm [shape: f32[1,8,128], index: 2, kind: output, shape index: {0}]   ;;  %s593_s3 = inlined_call_operand.hbm [shape: f32[1,16,128], index: 3, kind: output, shape index: {1}]  }
   0x1   :  { %10 = vsyncpa [#allocation6], 0 }
   0x2   :  { %11 = vsyncpa [#allocation4], 0 }
   0x3   :  { %12 = vsyncpa [#allocation9], 0  ;;  %s484_s12 = smov [#allocation2]   ;;  %s485_s14 = smov [#allocation5]  }
   0x4   :  { %s19_s13 = sshll.u32 %s484_s12, 4  ;;  %s29_s15 = sshll.u32 %s485_s14, 4  ;;  %s20_s13 = int_to_ptr.vmem [resolvable:$true] %s19_s13  ;;  %s30_s15 = int_to_ptr.vmem [resolvable:$true] %s29_s15 }
   0x5   :  { %s388_s18 = scalar_lea.hbm %s590_s0, 128 }
   0x6   :  { %p389_p0 = scmp.ne.s32.totalorder %s590_s0, %s388_s18  ;;  %p392_p1 = scmp.lt.u32.totalorder %s388_s18, %s590_s0 }
   0x8   :  { %p394_p2 = pnand %p392_p1, %p389_p0 }
   0xa   :  { %397 = shalt.err (!%p394_p2)
}
   0xb   :  { %s398_s23 = scalar_lea.vmem %s20_s13, 128  ;;  %p403_p4 = scmp.lt.s32.totalorder %s20_s13, %s20_s13 }
   0xc   :  { %p399_p3 = scmp.ne.s32.totalorder %s20_s13, %s398_s23  ;;  %p404_p5 = scmp.lt.s32.totalorder %s398_s23, %s398_s23 }
   0xe   :  { %p405_p6 = por %p404_p5, %p403_p4 }
  0x10   :  { %p406_p7 = pnand %p405_p6, %p399_p3 }
  0x12   :  { %409 = shalt.err (!%p406_p7)
}
  0x13   :  { %22 = dma.hbm_to_vmem [thread:$0]  %s590_s0, 128, %s20_s13, [#allocation3]  }
  0x14   :  { %s410_s28 = scalar_lea.hbm %s591_s1, 128 }
  0x15   :  { %p411_p8 = scmp.ne.s32.totalorder %s591_s1, %s410_s28  ;;  %p414_p9 = scmp.lt.u32.totalorder %s410_s28, %s591_s1 }
  0x17   :  { %p416_p10 = pnand %p414_p9, %p411_p8 }
  0x19   :  { %419 = shalt.err (!%p416_p10)
}
  0x1a   :  { %s420_s6 = scalar_lea.vmem %s30_s15, 128  ;;  %p425_p12 = scmp.lt.s32.totalorder %s30_s15, %s30_s15 }
  0x1b   :  { %p421_p11 = scmp.ne.s32.totalorder %s30_s15, %s420_s6  ;;  %p426_p13 = scmp.lt.s32.totalorder %s420_s6, %s420_s6 }
  0x1d   :  { %p427_p0 = por %p426_p13, %p425_p12 }
  0x1f   :  { %p428_p1 = pnand %p427_p0, %p421_p11 }
  0x21   :  { %431 = shalt.err (!%p428_p1)
}
  0x22   :  { %32 = dma.hbm_to_vmem [thread:$0]  %s591_s1, 128, %s30_s15, [#allocation6]  }
  0x23   :  { %476 = dma.done.wait [#allocation3], 128  }
  0x24   :  { %477 = vsyncadd [#allocation3], 4294967168 }
  0x25   :  { %478 = dma.done.wait [#allocation6], 128  }
  0x26   :  { %479 = vsyncadd [#allocation6], 4294967168  ;;  %v39_v0 = vlaneseq  ;;  %vm51_vm1 = vcmask 130048   ;;  %v486_v4 = vmov 0.0   ;;  %v50_v6 = vld [vmem:[#allocation2] sm:$0xff]  ;;  %v136_v7 = vld [vmem:[#allocation5] sm:$0xff] }
  0x27   :  { %355 = vmatprep.subr.msk.mxu0 %vm51_vm1, %v50_v6  ;;  %360 = vmatprep.subr.msk.mxu1 %vm51_vm1, %v136_v7  ;;  %vm219_vm3 = vcmask 64512   ;;  %s487_s1 = smov [#allocation7]   ;;  %s488_s9 = smov [#allocation8]  }
  0x28   :  { %v40_v1 = vshrl.u32 %v39_v0, 7  ;;  %v535_v2 = vand.u32 127, %v39_v0  ;;  %356 = vmatpush3.xpose.msk.msra.mxu0 %vm51_vm1, %v50_v6  ;;  %361 = vmatpush3.xpose.msk.msra.mxu1 %vm51_vm1, %v136_v7  ;;  %s315_s8 = sshll.u32 %s487_s1, 4  ;;  %s324_s10 = sshll.u32 %s488_s9, 4  ;;  %s316_s8 = int_to_ptr.vmem [resolvable:$true] %s315_s8  ;;  %s559_s10 = int_to_ptr.vmem [resolvable:$true] %s324_s10 }
  0x29   :  { %s432_s11 = scalar_lea.vmem %s316_s8, 128  ;;  %p437_p3 = scmp.lt.s32.totalorder %s316_s8, %s316_s8 }
  0x2a   :  { %v41_v3 = vadd.s32 8, %v40_v1  ;;  %vm44_vm0 = vcmp.eq.s32.totalorder %v40_v1, %v535_v2  ;;  %vm218_vm4 = vcmp.lt.s32.totalorder %v535_v2, 8  ;;  %p433_p2 = scmp.ne.s32.totalorder %s316_s8, %s432_s11  ;;  %p438_p4 = scmp.lt.s32.totalorder %s432_s11, %s432_s11 }
  0x2b   :  { %v341_v5 = vsel %vm44_vm0, 1.0, %v486_v4 }
  0x2c   :  { %vm45_vm2 = vcmp.eq.s32.totalorder %v41_v3, %v535_v2  ;;  %357 = vmatprep.mubr.msk.f32.mxu0 %vm51_vm1, %v341_v5  ;;  %362 = vmatprep.mubr.msk.f32.mxu1 %vm51_vm1, %v341_v5  ;;  %p439_p5 = por %p438_p4, %p437_p3 }
  0x2d   :  { %v342_v8 = vsel %vm45_vm2, 1.0, %v486_v4 }
  0x2e   :  { %358 = vmatmul.mubr.msk.f32.vlgmr.msra.gmra.mrb[0].mxu0 %vm51_vm1, %v342_v8  ;;  %363 = vmatmul.mubr.msk.f32.vlgmr.msra.gmra.mrb[0].mxu1 %vm51_vm1, %v342_v8  ;;  %p440_p6 = pnand %p439_p5, %p433_p2 }
 0x101   :  { %v359_v9 = vpop.f32.mrb[0].mxu0  ;;  %v364_v10 = vpop.f32.mrb[0].mxu1 }
 0x102   :  { %v221_v11 = vsel %vm219_vm3, %v359_v9, -inf  ;;  %v245_v12 = vsel %vm219_vm3, %v364_v10, -inf  ;;  %v127_v13 = vpop.f32.mrb[1].mxu0  ;;  %v206_v14 = vpop.f32.mrb[1].mxu1 }
 0x103   :  { %v220_v15 = vsel %vm219_vm3, %v127_v13, -inf  ;;  %v244_v16 = vsel %vm219_vm3, %v206_v14, -inf }
 0x104   :  { %v222_v17 = vmax.f32 %v220_v15, %v221_v11  ;;  %v246_v18 = vmax.f32 %v244_v16, %v245_v12 }
 0x106   :  { %v223_v19 = vrot.slane %v222_v17, 4  ;;  %v247_v20 = vrot.slane %v246_v18, 4 }
 0x108   :  { %v224_v21 = vmax.f32 %v222_v17, %v223_v19  ;;  %v248_v22 = vmax.f32 %v246_v18, %v247_v20 }
 0x10a   :  { %v225_v23 = vrot.slane %v224_v21, 2  ;;  %v249_v24 = vrot.slane %v248_v22, 2 }
 0x10c   :  { %v226_v25 = vmax.f32 %v224_v21, %v225_v23  ;;  %v250_v26 = vmax.f32 %v248_v22, %v249_v24 }
 0x10e   :  { %v227_v27 = vrot.slane %v226_v25, 1  ;;  %v251_v28 = vrot.slane %v250_v26, 1 }
 0x110   :  { %v228_v29 = vmax.f32 %v226_v25, %v227_v27  ;;  %v252_v30 = vmax.f32 %v250_v26, %v251_v28 }
 0x112   :  { %v229_v31 = vsub.f32 %v127_v13, %v228_v29  ;;  %v230_v32 = vsub.f32 %v359_v9, %v228_v29  ;;  %v253_v33 = vsub.f32 %v206_v14, %v252_v30  ;;  %v254_v34 = vsub.f32 %v364_v10, %v252_v30 }
 0x114   :  { %v231_v35 = vmul.f32 1.442695, %v229_v31  ;;  %v233_v36 = vmul.f32 1.442695, %v230_v32  ;;  %v255_v37 = vmul.f32 1.442695, %v253_v33 }
 0x115   :  { %v257_v38 = vmul.f32 1.442695, %v254_v34 }
 0x116   :  { %372 = vpow2.f32 %v231_v35 }
 0x117   :  { %374 = vpow2.f32 %v233_v36 }
 0x118   :  { %376 = vpow2.f32 %v255_v37 }
 0x119   :  { %378 = vpow2.f32 %v257_v38 }
 0x120   :  { %v373_v39 = vpop.eup %372 }
 0x121   :  { %v375_v40 = vpop.eup %374  ;;  %v235_v41 = vsel %vm219_vm3, %v373_v39, 0.0 }
 0x122   :  { %v377_v42 = vpop.eup %376  ;;  %v236_v43 = vsel %vm219_vm3, %v375_v40, 0.0 }
 0x123   :  { %v379_v44 = vpop.eup %378  ;;  %v259_v45 = vsel %vm219_vm3, %v377_v42, 0.0  ;;  %v268_v46 = vmul.f32 %v377_v42, %v373_v39  ;;  %v237_v47 = vadd.f32 %v236_v43, %v235_v41 }
 0x124   :  { %v260_v48 = vsel %vm219_vm3, %v379_v44, 0.0  ;;  %v269_v49 = vmul.f32 %v379_v44, %v375_v40 }
 0x125   :  { %v261_v50 = vadd.f32 %v260_v48, %v259_v45  ;;  %v270_v51 = vsel %vm219_vm3, %v268_v46, 0.0  ;;  %v238_v52 = vrot.slane %v237_v47, 4 }
 0x126   :  { %v271_v53 = vsel %vm219_vm3, %v269_v49, 0.0 }
 0x127   :  { %v272_v54 = vadd.f32 %v271_v53, %v270_v51  ;;  %v239_v55 = vadd.f32 %v238_v52, %v237_v47  ;;  %v262_v56 = vrot.slane %v261_v50, 4 }
 0x129   :  { %v240_v57 = vrot.slane %v239_v55, 2  ;;  %v263_v58 = vadd.f32 %v262_v56, %v261_v50  ;;  %v273_v59 = vrot.slane %v272_v54, 4 }
 0x12b   :  { %v241_v60 = vadd.f32 %v240_v57, %v239_v55  ;;  %v264_v61 = vrot.slane %v263_v58, 2  ;;  %v274_v62 = vadd.f32 %v273_v59, %v272_v54 }
 0x12d   :  { %v242_v63 = vrot.slane %v241_v60, 1  ;;  %v265_v0 = vadd.f32 %v264_v61, %v263_v58  ;;  %v275_v1 = vrot.slane %v274_v62, 2 }
 0x12f   :  { %v243_v3 = vadd.f32 %v242_v63, %v241_v60  ;;  %v266_v4 = vrot.slane %v265_v0, 1  ;;  %v276_v5 = vadd.f32 %v275_v1, %v274_v62 }
 0x131   :  { %380 = vrcp.f32 %v243_v3  ;;  %v267_v6 = vadd.f32 %v266_v4, %v265_v0  ;;  %v277_v7 = vrot.slane %v276_v5, 1 }
 0x132   :  { %382 = vlog2.f32 %v243_v3 }
 0x133   :  { %v278_v8 = vadd.f32 %v277_v7, %v276_v5  ;;  %384 = vlog2.f32 %v267_v6 }
 0x135   :  { %386 = vlog2.f32 %v278_v8 }
 0x13b   :  { %v381_v9 = vpop.eup %380 }
 0x13c   :  { %v295_v10 = vmul.f32 %v381_v9, %v375_v40  ;;  %v294_v11 = vmul.f32 %v381_v9, %v373_v39  ;;  %v383_v12 = vpop.eup %382 }
 0x13d   :  { %v385_v13 = vpop.eup %384  ;;  %v282_v18 = vmul.f32 0.6931472, %v383_v12 }
 0x13e   :  { %v299_v14 = vsel %vm218_vm4, %v295_v10, 0.0  ;;  %v285_v20 = vmul.f32 0.6931472, %v385_v13  ;;  %v298_v25 = vsel %vm218_vm4, %v294_v11, 0.0 }
 0x13f   :  { %v387_v15 = vpop.eup %386  ;;  %v303_v16 = vsel %vm219_vm3, %v299_v14, 0.0  ;;  %v300_v26 = vsel %vm219_vm3, %v298_v25, 0.0 }
 0x140   :  { %304 = vadd.xlane.f32.xlu1 %v303_v16  ;;  %v280_v17 = vmul.f32 0.6931472, %v387_v15 }
 0x142   :  { %v283_v19 = vsub.f32 %v280_v17, %v282_v18 }
 0x144   :  { %v286_v21 = vsub.f32 %v283_v19, %v285_v20 }
 0x146   :  { %v287_v22 = vmax.f32 %v286_v21, -100.0 }
 0x148   :  { %v288_v23 = vsel %vm218_vm4, %v287_v22, 0.0 }
 0x149   :  { %v289_v24 = vsel %vm219_vm3, %v288_v23, 0.0 }
 0x14a   :  { %290 = vadd.xlane.f32.xlu0 %v289_v24 }
 0x14e   :  { %301 = vadd.xlane.f32.xlu0 %v300_v26 }
 0x1cd   :  { %v305_v27 = vpop.xlane.xlu1 %304 }
 0x1ce   :  { %308 = vst [vmem:[#allocation8 + $0x8] sm:$0xff] %v305_v27 }
 0x1d7   :  { %v291_v28 = vpop.xlane.xlu0 %290 }
 0x1d8   :  { %306 = vst [vmem:[#allocation7] sm:$0xff] %v291_v28 }
 0x1d9   :  { %443 = shalt.err (!%p440_p6)
}
 0x1da   :  { %s444_s14 = scalar_lea.hbm %s592_s2, 128 }
 0x1db   :  { %p445_p7 = scmp.ne.s32.totalorder %s592_s2, %s444_s14  ;;  %p448_p8 = scmp.lt.u32.totalorder %s444_s14, %s592_s2 }
 0x1dd   :  { %p450_p9 = pnand %p448_p8, %p445_p7 }
 0x1df   :  { %453 = shalt.err (!%p450_p9)
}
 0x1e0   :  { %318 = dma.vmem_to_hbm [thread:$0]  %s316_s8, 128, %s592_s2, [#allocation4]   ;;  %v302_v2 = vpop.xlane.xlu0 %301 }
 0x1e1   :  { %307 = vst [vmem:[#allocation8] sm:$0xff] %v302_v2  ;;  %s454_s21 = scalar_lea.vmem %s559_s10, 256  ;;  %p459_p11 = scmp.lt.s32.totalorder %s559_s10, %s559_s10 }
 0x1e2   :  { %p455_p10 = scmp.ne.s32.totalorder %s559_s10, %s454_s21  ;;  %p460_p12 = scmp.lt.s32.totalorder %s454_s21, %s454_s21 }
 0x1e4   :  { %p461_p13 = por %p460_p12, %p459_p11 }
 0x1e6   :  { %p462_p0 = pnand %p461_p13, %p455_p10 }
 0x1e8   :  { %465 = shalt.err (!%p462_p0)
}
 0x1e9   :  { %s466_s24 = scalar_lea.hbm %s593_s3, 256 }
 0x1ea   :  { %p467_p1 = scmp.ne.s32.totalorder %s593_s3, %s466_s24  ;;  %p470_p2 = scmp.lt.u32.totalorder %s466_s24, %s593_s3 }
 0x1ec   :  { %p472_p3 = pnand %p470_p2, %p467_p1 }
 0x1ee   :  { %475 = shalt.err (!%p472_p3)
}
 0x1ef   :  { %s489_s28 = smov 128   ;;  %s490_s29 = smov 8  }
 0x1f0   :  { %330 = dma.vmem_to_hbm [thread:$0]  %s559_s10, 256, %s593_s3, [#allocation9], %s489_s28, %s489_s28, %s490_s29  }
 0x1f1   :  { %480 = dma.done.wait [#allocation4], 128  }
 0x1f2   :  { %481 = vsyncadd [#allocation4], 4294967168 }
 0x1f3   :  { %482 = dma.done.wait [#allocation9], 256  }
 0x1f4   :  { %483 = vsyncadd [#allocation9], 4294967040 }
 0x1f5   :  { %337 = vsyncpa [#allocation3], 1 }
 0x1f6   :  { %338 = vsyncpa [#allocation6], 1 }
 0x1f7   :  { %339 = vsyncpa [#allocation4], 1 }
 0x1f8   :  { %340 = vsyncpa [#allocation9], 1 }

</bundles_post_ra>
